<compile_context>
chip_gen: v7x
topology: tpu7x:2x2x1
jax: 0.10.0
libtpu: 0.0.40
codegen_flags: <defaults>
</compile_context>

<pallas_src>
import jax
import jax.numpy as jnp
from jax import lax
from jax.experimental import pallas as pl
from jax.experimental.pallas import tpu as pltpu

# ---------------- config (small, consistent with the module) ----------------
B, T, E, HEADS, COEF = 2, 8, 32, 4, 4
HE = HEADS * E          # 128 — per-projection output width
HID = COEF * E          # 128 — FFN hidden dim
BT = B * T              # 16  — all batch rows processed in one shot
EPS = 1e-5              # PyTorch LayerNorm default eps
NEG_INF = -1e30         # additive mask value (safe in f32; every row has T unmasked cols)


def _layer_norm(x, gamma, beta):
    mu = jnp.mean(x, axis=-1, keepdims=True)
    var = jnp.mean((x - mu) ** 2, axis=-1, keepdims=True)
    return (x - mu) * lax.rsqrt(var + EPS) * gamma + beta


def transformer_block_kernel(x_ref, wqkv_ref, mask_ref, vecs_ref,
                             w1_ref, w2_ref, o_ref):
    x = x_ref[...]                         # (BT, E)
    mask = mask_ref[...]                   # (BT, BT) additive block-diagonal mask
    vecs = vecs_ref[...]                   # (8, HID) packed small vectors

    bu, g1, be1 = vecs[0:1, :E], vecs[1:2, :E], vecs[2:3, :E]
    b1 = vecs[3:4, :HID]
    b2, g2, be2 = vecs[4:5, :E], vecs[5:6, :E], vecs[6:7, :E]

    # ---------------- fused Q / K / (V·Wu) projection: one lane-dense matmul ----------------
    qkv = jnp.dot(x, wqkv_ref[...], preferred_element_type=jnp.float32)   # (BT, 3*HE) = (16, 384)

    # (q / E**0.25) @ (k / E**0.25)^T  ==  (q @ k^T) / sqrt(E): scale applied once to scores.
    scale = jnp.float32(1.0 / (E ** 0.5))

    # ---------------- multi-head attention ----------------
    attn = jnp.zeros((BT, E), jnp.float32)
    for h in range(HEADS):                 # static unroll, H = 4
        q_h = qkv[:, h * E:(h + 1) * E]                    # (BT, E)
        k_h = qkv[:, HE + h * E:HE + (h + 1) * E]          # (BT, E)
        v_h = qkv[:, 2 * HE + h * E:2 * HE + (h + 1) * E]  # (BT, E) — Wu already folded in

        # q @ k^T via NT dot_general (no explicit transpose), scale once, add mask.
        s = lax.dot_general(q_h, k_h, (((1,), (1,)), ((), ())),
                            preferred_element_type=jnp.float32) * scale + mask
        s = s - jnp.max(s, axis=-1, keepdims=True)         # softmax over key dim
        p = jnp.exp(s)
        p = p / jnp.sum(p, axis=-1, keepdims=True)         # exact divide (EUP is idle anyway)

        attn = attn + jnp.dot(p, v_h, preferred_element_type=jnp.float32)  # (BT, E)
    attn = attn + bu

    # ---------------- residual + LayerNorm 1 ----------------
    n1 = _layer_norm(attn + x, g1, be1)

    # TODO(synk): nn.Dropout is identity at inference time; no stochastic dropout in-kernel.

    # ---------------- feed-forward ----------------
    hdn = jnp.maximum(
        jnp.dot(n1, w1_ref[...], preferred_element_type=jnp.float32) + b1, 0.0)
    ff = jnp.dot(hdn, w2_ref[...], preferred_element_type=jnp.float32) + b2

    # ---------------- residual + LayerNorm 2 ----------------
    o_ref[...] = _layer_norm(ff + n1, g2, be2).astype(o_ref.dtype)


def prepare_params(params):
    """One-time (parameter-load-time) preprocessing; NOT part of the per-call path."""
    (wq, wk, wv, wu, bu, g1, be1, w1, b1, w2, b2, g2, be2) = params
    hp = jax.lax.Precision.HIGHEST

    # Fold unify_heads into the value projection: wvu[:, h*E:(h+1)*E] = wv_h @ wu_h.
    wvu = jnp.concatenate(
        [jnp.dot(wv[:, h * E:(h + 1) * E], wu[h * E:(h + 1) * E, :], precision=hp)
         for h in range(HEADS)], axis=1)                              # (E, H*E)
    wqkv = jnp.concatenate([wq, wk, wvu], axis=1)                     # (E, 3*H*E) = (32, 384)

    # Additive block-diagonal mask: tokens only attend within their own batch element.
    row_b = jnp.arange(BT, dtype=jnp.int32)[:, None] // T
    col_b = jnp.arange(BT, dtype=jnp.int32)[None, :] // T
    mask = jnp.where(row_b == col_b, 0.0, NEG_INF).astype(jnp.float32)  # (BT, BT)

    # Pack the 7 small vectors into one (8, 128) slab (one VMEM tile, one DMA).
    vecs = jnp.zeros((8, HID), jnp.float32)
    vecs = vecs.at[0, :E].set(bu.reshape(-1))
    vecs = vecs.at[1, :E].set(g1.reshape(-1))
    vecs = vecs.at[2, :E].set(be1.reshape(-1))
    vecs = vecs.at[3, :HID].set(b1.reshape(-1))
    vecs = vecs.at[4, :E].set(b2.reshape(-1))
    vecs = vecs.at[5, :E].set(g2.reshape(-1))
    vecs = vecs.at[6, :E].set(be2.reshape(-1))

    return (wqkv, mask, vecs, w1, w2)


@jax.jit
def transformer_block(x, prepped):
    """x: (B, T, E) float32, prepped: output of prepare_params -> (B, T, E) float32."""
    wqkv, mask, vecs, w1, w2 = prepped
    xf = x.reshape(BT, E)                               # flatten batch: 16 rows per MXU push

    vmem = pl.BlockSpec(memory_space=pltpu.MemorySpace.VMEM)   # whole array resident in VMEM
    args = (xf, wqkv, mask, vecs, w1, w2)

    out = pl.pallas_call(
        transformer_block_kernel,
        out_shape=jax.ShapeDtypeStruct((BT, E), jnp.float32),
        in_specs=[vmem] * len(args),
        out_specs=vmem,
    )(*args)
    return out.reshape(B, T, E)


# ---------------- pure-JAX reference (mirrors the PyTorch forward, exact f32) ----------------
def reference(x, params):
    (wq, wk, wv, wu, bu, g1, be1, w1, b1, w2, b2, g2, be2) = params
    b, t, e = x.shape
    hp = jax.lax.Precision.HIGHEST
    scale = 1.0 / (e ** 0.25)

    def proj(w):
        return jnp.dot(x, w, precision=hp).reshape(b, t, HEADS, e).transpose(0, 2, 1, 3)

    q, k, v = proj(wq) * scale, proj(wk) * scale, proj(wv)
    dot = jnp.einsum('bhqe,bhke->bhqk', q, k, precision=hp)
    dot = jax.nn.softmax(dot, axis=-1)
    out = jnp.einsum('bhqk,bhke->bhqe', dot, v, precision=hp)
    out = out.transpose(0, 2, 1, 3).reshape(b, t, HEADS * e)
    attn = jnp.dot(out, wu, precision=hp) + bu[0]

    def ln(y, g, bb):
        mu = jnp.mean(y, axis=-1, keepdims=True)
        var = jnp.mean((y - mu) ** 2, axis=-1, keepdims=True)
        return (y - mu) * jax.lax.rsqrt(var + EPS) * g[0] + bb[0]

    n1 = ln(attn + x, g1, be1)
    ff = jnp.dot(jnp.maximum(jnp.dot(n1, w1, precision=hp) + b1[0], 0.0),
                 w2, precision=hp) + b2[0]
    return ln(ff + n1, g2, be2)


if __name__ == "__main__":
    key = jax.random.PRNGKey(0)
    ks = jax.random.split(key, 8)

    x = jax.random.normal(ks[0], (B, T, E), dtype=jnp.float32)

    def init_w(k, fan_in, shape):
        return jax.random.normal(k, shape, dtype=jnp.float32) / jnp.sqrt(fan_in)

    wq = init_w(ks[1], E, (E, HEADS * E))
    wk = init_w(ks[2], E, (E, HEADS * E))
    wv = init_w(ks[3], E, (E, HEADS * E))
    wu = init_w(ks[4], HEADS * E, (HEADS * E, E))
    bu = jax.random.normal(ks[5], (1, E), dtype=jnp.float32) * 0.01
    # LayerNorm defaults: weight=1, bias=0
    g1 = jnp.ones((1, E), jnp.float32)
    be1 = jnp.zeros((1, E), jnp.float32)
    g2 = jnp.ones((1, E), jnp.float32)
    be2 = jnp.zeros((1, E), jnp.float32)
    w1 = init_w(ks[6], E, (E, HID))
    b1 = jnp.zeros((1, HID), jnp.float32)
    w2 = init_w(ks[7], HID, (HID, E))
    b2 = jnp.zeros((1, E), jnp.float32)

    params = (wq, wk, wv, wu, bu, g1, be1, w1, b1, w2, b2, g2, be2)

    prepped = prepare_params(params)          # one-time weight preprocessing (hoisted)
    out = jax.block_until_ready(transformer_block(x, prepped))
    ref = jax.block_until_ready(reference(x, params))

    assert out.shape == (B, T, E)
    # Tolerance covers MXU contraction-precision differences across TPU generations and the
    # offline (V @ Wu) reassociation; the approximate softmax reciprocal has been removed.
    err = jnp.max(jnp.abs(out - ref))
    assert jnp.allclose(out, ref, atol=5e-3, rtol=5e-3), f"max abs err {err}"
    print("KERNEL_OK")
</pallas_src>

<mosaic_0001>
module attributes {stable_mosaic.version = 11 : i64} {
  func.func @transformer_block_kernel(%arg0: memref<16x32xf32, #tpu.memory_space<vmem>>, %arg1: memref<32x384xf32, #tpu.memory_space<vmem>>, %arg2: memref<16x16xf32, #tpu.memory_space<vmem>>, %arg3: memref<8x128xf32, #tpu.memory_space<vmem>>, %arg4: memref<32x128xf32, #tpu.memory_space<vmem>>, %arg5: memref<128x32xf32, #tpu.memory_space<vmem>>, %arg6: memref<16x32xf32, #tpu.memory_space<vmem>>) attributes {dimension_semantics = [], scalar_prefetch = 0 : i64, scratch_operands = 0 : i64, tpu.core_type = #tpu.core_type<tc>} {
    %c0 = arith.constant 0 : index
    %c0_0 = arith.constant 0 : index
    %0 = vector.load %arg0[%c0, %c0_0] : memref<16x32xf32, #tpu.memory_space<vmem>>, vector<16x32xf32>
    %c0_1 = arith.constant 0 : index
    %c0_2 = arith.constant 0 : index
    %1 = vector.load %arg2[%c0_1, %c0_2] : memref<16x16xf32, #tpu.memory_space<vmem>>, vector<16x16xf32>
    %c0_3 = arith.constant 0 : index
    %c0_4 = arith.constant 0 : index
    %2 = vector.load %arg3[%c0_3, %c0_4] : memref<8x128xf32, #tpu.memory_space<vmem>>, vector<8x128xf32>
    %3 = vector.extract_strided_slice %2 {offsets = [0, 0], sizes = [1, 32], strides = [1, 1]} : vector<8x128xf32> to vector<1x32xf32>
    %4 = vector.extract_strided_slice %2 {offsets = [1, 0], sizes = [1, 32], strides = [1, 1]} : vector<8x128xf32> to vector<1x32xf32>
    %5 = vector.extract_strided_slice %2 {offsets = [2, 0], sizes = [1, 32], strides = [1, 1]} : vector<8x128xf32> to vector<1x32xf32>
    %6 = vector.extract_strided_slice %2 {offsets = [3, 0], sizes = [1, 128], strides = [1, 1]} : vector<8x128xf32> to vector<1x128xf32>
    %7 = vector.extract_strided_slice %2 {offsets = [4, 0], sizes = [1, 32], strides = [1, 1]} : vector<8x128xf32> to vector<1x32xf32>
    %8 = vector.extract_strided_slice %2 {offsets = [5, 0], sizes = [1, 32], strides = [1, 1]} : vector<8x128xf32> to vector<1x32xf32>
    %9 = vector.extract_strided_slice %2 {offsets = [6, 0], sizes = [1, 32], strides = [1, 1]} : vector<8x128xf32> to vector<1x32xf32>
    %c0_5 = arith.constant 0 : index
    %c0_6 = arith.constant 0 : index
    %10 = vector.load %arg1[%c0_5, %c0_6] : memref<32x384xf32, #tpu.memory_space<vmem>>, vector<32x384xf32>
    %cst = arith.constant dense<0.000000e+00> : vector<16x384xf32>
    %11 = tpu.matmul %0, %10, %cst {dimension_numbers = #tpu.dot_dimension_numbers<[1], [0], [0], [1], [0, 0, 1, 1], [], []>} : vector<16x32xf32>, vector<32x384xf32>, vector<16x384xf32> -> vector<16x384xf32>
    %cst_7 = arith.constant 0.000000e+00 : f32
    %12 = vector.broadcast %cst_7 : f32 to vector<16x32xf32>
    %13 = vector.extract_strided_slice %11 {offsets = [0, 0], sizes = [16, 32], strides = [1, 1]} : vector<16x384xf32> to vector<16x32xf32>
    %14 = vector.extract_strided_slice %11 {offsets = [0, 128], sizes = [16, 32], strides = [1, 1]} : vector<16x384xf32> to vector<16x32xf32>
    %15 = vector.extract_strided_slice %11 {offsets = [0, 256], sizes = [16, 32], strides = [1, 1]} : vector<16x384xf32> to vector<16x32xf32>
    %cst_8 = arith.constant dense<0.000000e+00> : vector<16x16xf32>
    %16 = tpu.matmul %13, %14, %cst_8 {dimension_numbers = #tpu.dot_dimension_numbers<[1], [1], [0], [0], [0, 0, 1, 0], [], []>} : vector<16x32xf32>, vector<16x32xf32>, vector<16x16xf32> -> vector<16x16xf32>
    %cst_9 = arith.constant 0.176776692 : f32
    %17 = vector.broadcast %cst_9 : f32 to vector<16x16xf32>
    %18 = arith.mulf %16, %17 : vector<16x16xf32>
    %19 = arith.addf %18, %1 : vector<16x16xf32>
    %cst_10 = arith.constant dense<0xFF800000> : vector<16xf32>
    %20 = vector.multi_reduction <maximumf>, %19, %cst_10 [1] : vector<16x16xf32> to vector<16xf32>
    %21 = vector.shape_cast %20 : vector<16xf32> to vector<16x1xf32>
    %22 = vector.broadcast %21 : vector<16x1xf32> to vector<16x16xf32>
    %23 = arith.subf %19, %22 : vector<16x16xf32>
    %24 = math.exp %23 : vector<16x16xf32>
    %cst_11 = arith.constant dense<0.000000e+00> : vector<16xf32>
    %25 = vector.multi_reduction <add>, %24, %cst_11 [1] : vector<16x16xf32> to vector<16xf32>
    %26 = vector.shape_cast %25 : vector<16xf32> to vector<16x1xf32>
    %27 = vector.broadcast %26 : vector<16x1xf32> to vector<16x16xf32>
    %28 = arith.divf %24, %27 : vector<16x16xf32>
    %cst_12 = arith.constant dense<0.000000e+00> : vector<16x32xf32>
    %29 = tpu.matmul %28, %15, %cst_12 {dimension_numbers = #tpu.dot_dimension_numbers<[1], [0], [0], [1], [0, 0, 1, 1], [], []>} : vector<16x16xf32>, vector<16x32xf32>, vector<16x32xf32> -> vector<16x32xf32>
    %30 = arith.addf %12, %29 : vector<16x32xf32>
    %31 = vector.extract_strided_slice %11 {offsets = [0, 32], sizes = [16, 32], strides = [1, 1]} : vector<16x384xf32> to vector<16x32xf32>
    %32 = vector.extract_strided_slice %11 {offsets = [0, 160], sizes = [16, 32], strides = [1, 1]} : vector<16x384xf32> to vector<16x32xf32>
    %33 = vector.extract_strided_slice %11 {offsets = [0, 288], sizes = [16, 32], strides = [1, 1]} : vector<16x384xf32> to vector<16x32xf32>
    %cst_13 = arith.constant dense<0.000000e+00> : vector<16x16xf32>
    %34 = tpu.matmul %31, %32, %cst_13 {dimension_numbers = #tpu.dot_dimension_numbers<[1], [1], [0], [0], [0, 0, 1, 0], [], []>} : vector<16x32xf32>, vector<16x32xf32>, vector<16x16xf32> -> vector<16x16xf32>
    %cst_14 = arith.constant 0.176776692 : f32
    %35 = vector.broadcast %cst_14 : f32 to vector<16x16xf32>
    %36 = arith.mulf %34, %35 : vector<16x16xf32>
    %37 = arith.addf %36, %1 : vector<16x16xf32>
    %cst_15 = arith.constant dense<0xFF800000> : vector<16xf32>
    %38 = vector.multi_reduction <maximumf>, %37, %cst_15 [1] : vector<16x16xf32> to vector<16xf32>
    %39 = vector.shape_cast %38 : vector<16xf32> to vector<16x1xf32>
    %40 = vector.broadcast %39 : vector<16x1xf32> to vector<16x16xf32>
    %41 = arith.subf %37, %40 : vector<16x16xf32>
    %42 = math.exp %41 : vector<16x16xf32>
    %cst_16 = arith.constant dense<0.000000e+00> : vector<16xf32>
    %43 = vector.multi_reduction <add>, %42, %cst_16 [1] : vector<16x16xf32> to vector<16xf32>
    %44 = vector.shape_cast %43 : vector<16xf32> to vector<16x1xf32>
    %45 = vector.broadcast %44 : vector<16x1xf32> to vector<16x16xf32>
    %46 = arith.divf %42, %45 : vector<16x16xf32>
    %cst_17 = arith.constant dense<0.000000e+00> : vector<16x32xf32>
    %47 = tpu.matmul %46, %33, %cst_17 {dimension_numbers = #tpu.dot_dimension_numbers<[1], [0], [0], [1], [0, 0, 1, 1], [], []>} : vector<16x16xf32>, vector<16x32xf32>, vector<16x32xf32> -> vector<16x32xf32>
    %48 = arith.addf %30, %47 : vector<16x32xf32>
    %49 = vector.extract_strided_slice %11 {offsets = [0, 64], sizes = [16, 32], strides = [1, 1]} : vector<16x384xf32> to vector<16x32xf32>
    %50 = vector.extract_strided_slice %11 {offsets = [0, 192], sizes = [16, 32], strides = [1, 1]} : vector<16x384xf32> to vector<16x32xf32>
    %51 = vector.extract_strided_slice %11 {offsets = [0, 320], sizes = [16, 32], strides = [1, 1]} : vector<16x384xf32> to vector<16x32xf32>
    %cst_18 = arith.constant dense<0.000000e+00> : vector<16x16xf32>
    %52 = tpu.matmul %49, %50, %cst_18 {dimension_numbers = #tpu.dot_dimension_numbers<[1], [1], [0], [0], [0, 0, 1, 0], [], []>} : vector<16x32xf32>, vector<16x32xf32>, vector<16x16xf32> -> vector<16x16xf32>
    %cst_19 = arith.constant 0.176776692 : f32
    %53 = vector.broadcast %cst_19 : f32 to vector<16x16xf32>
    %54 = arith.mulf %52, %53 : vector<16x16xf32>
    %55 = arith.addf %54, %1 : vector<16x16xf32>
    %cst_20 = arith.constant dense<0xFF800000> : vector<16xf32>
    %56 = vector.multi_reduction <maximumf>, %55, %cst_20 [1] : vector<16x16xf32> to vector<16xf32>
    %57 = vector.shape_cast %56 : vector<16xf32> to vector<16x1xf32>
    %58 = vector.broadcast %57 : vector<16x1xf32> to vector<16x16xf32>
    %59 = arith.subf %55, %58 : vector<16x16xf32>
    %60 = math.exp %59 : vector<16x16xf32>
    %cst_21 = arith.constant dense<0.000000e+00> : vector<16xf32>
    %61 = vector.multi_reduction <add>, %60, %cst_21 [1] : vector<16x16xf32> to vector<16xf32>
    %62 = vector.shape_cast %61 : vector<16xf32> to vector<16x1xf32>
    %63 = vector.broadcast %62 : vector<16x1xf32> to vector<16x16xf32>
    %64 = arith.divf %60, %63 : vector<16x16xf32>
    %cst_22 = arith.constant dense<0.000000e+00> : vector<16x32xf32>
    %65 = tpu.matmul %64, %51, %cst_22 {dimension_numbers = #tpu.dot_dimension_numbers<[1], [0], [0], [1], [0, 0, 1, 1], [], []>} : vector<16x16xf32>, vector<16x32xf32>, vector<16x32xf32> -> vector<16x32xf32>
    %66 = arith.addf %48, %65 : vector<16x32xf32>
    %67 = vector.extract_strided_slice %11 {offsets = [0, 96], sizes = [16, 32], strides = [1, 1]} : vector<16x384xf32> to vector<16x32xf32>
    %68 = vector.extract_strided_slice %11 {offsets = [0, 224], sizes = [16, 32], strides = [1, 1]} : vector<16x384xf32> to vector<16x32xf32>
    %69 = vector.extract_strided_slice %11 {offsets = [0, 352], sizes = [16, 32], strides = [1, 1]} : vector<16x384xf32> to vector<16x32xf32>
    %cst_23 = arith.constant dense<0.000000e+00> : vector<16x16xf32>
    %70 = tpu.matmul %67, %68, %cst_23 {dimension_numbers = #tpu.dot_dimension_numbers<[1], [1], [0], [0], [0, 0, 1, 0], [], []>} : vector<16x32xf32>, vector<16x32xf32>, vector<16x16xf32> -> vector<16x16xf32>
    %cst_24 = arith.constant 0.176776692 : f32
    %71 = vector.broadcast %cst_24 : f32 to vector<16x16xf32>
    %72 = arith.mulf %70, %71 : vector<16x16xf32>
    %73 = arith.addf %72, %1 : vector<16x16xf32>
    %cst_25 = arith.constant dense<0xFF800000> : vector<16xf32>
    %74 = vector.multi_reduction <maximumf>, %73, %cst_25 [1] : vector<16x16xf32> to vector<16xf32>
    %75 = vector.shape_cast %74 : vector<16xf32> to vector<16x1xf32>
    %76 = vector.broadcast %75 : vector<16x1xf32> to vector<16x16xf32>
    %77 = arith.subf %73, %76 : vector<16x16xf32>
    %78 = math.exp %77 : vector<16x16xf32>
    %cst_26 = arith.constant dense<0.000000e+00> : vector<16xf32>
    %79 = vector.multi_reduction <add>, %78, %cst_26 [1] : vector<16x16xf32> to vector<16xf32>
    %80 = vector.shape_cast %79 : vector<16xf32> to vector<16x1xf32>
    %81 = vector.broadcast %80 : vector<16x1xf32> to vector<16x16xf32>
    %82 = arith.divf %78, %81 : vector<16x16xf32>
    %cst_27 = arith.constant dense<0.000000e+00> : vector<16x32xf32>
    %83 = tpu.matmul %82, %69, %cst_27 {dimension_numbers = #tpu.dot_dimension_numbers<[1], [0], [0], [1], [0, 0, 1, 1], [], []>} : vector<16x16xf32>, vector<16x32xf32>, vector<16x32xf32> -> vector<16x32xf32>
    %84 = arith.addf %66, %83 : vector<16x32xf32>
    %85 = vector.broadcast %3 : vector<1x32xf32> to vector<16x32xf32>
    %86 = arith.addf %84, %85 : vector<16x32xf32>
    %87 = arith.addf %86, %0 : vector<16x32xf32>
    %cst_28 = arith.constant dense<0.000000e+00> : vector<16xf32>
    %88 = vector.multi_reduction <add>, %87, %cst_28 [1] : vector<16x32xf32> to vector<16xf32>
    %89 = vector.shape_cast %88 : vector<16xf32> to vector<16x1xf32>
    %cst_29 = arith.constant 3.200000e+01 : f32
    %90 = vector.broadcast %cst_29 : f32 to vector<16x1xf32>
    %91 = arith.divf %89, %90 : vector<16x1xf32>
    %92 = vector.broadcast %91 : vector<16x1xf32> to vector<16x32xf32>
    %93 = arith.subf %87, %92 : vector<16x32xf32>
    %94 = arith.mulf %93, %93 : vector<16x32xf32>
    %cst_30 = arith.constant dense<0.000000e+00> : vector<16xf32>
    %95 = vector.multi_reduction <add>, %94, %cst_30 [1] : vector<16x32xf32> to vector<16xf32>
    %96 = vector.shape_cast %95 : vector<16xf32> to vector<16x1xf32>
    %cst_31 = arith.constant 3.200000e+01 : f32
    %97 = vector.broadcast %cst_31 : f32 to vector<16x1xf32>
    %98 = arith.divf %96, %97 : vector<16x1xf32>
    %99 = vector.broadcast %91 : vector<16x1xf32> to vector<16x32xf32>
    %100 = arith.subf %87, %99 : vector<16x32xf32>
    %cst_32 = arith.constant 9.99999974E-6 : f32
    %101 = vector.broadcast %cst_32 : f32 to vector<16x1xf32>
    %102 = arith.addf %98, %101 : vector<16x1xf32>
    %103 = math.rsqrt %102 : vector<16x1xf32>
    %104 = vector.broadcast %103 : vector<16x1xf32> to vector<16x32xf32>
    %105 = arith.mulf %100, %104 : vector<16x32xf32>
    %106 = vector.broadcast %4 : vector<1x32xf32> to vector<16x32xf32>
    %107 = arith.mulf %105, %106 : vector<16x32xf32>
    %108 = vector.broadcast %5 : vector<1x32xf32> to vector<16x32xf32>
    %109 = arith.addf %107, %108 : vector<16x32xf32>
    %c0_33 = arith.constant 0 : index
    %c0_34 = arith.constant 0 : index
    %110 = vector.load %arg4[%c0_33, %c0_34] : memref<32x128xf32, #tpu.memory_space<vmem>>, vector<32x128xf32>
    %cst_35 = arith.constant dense<0.000000e+00> : vector<16x128xf32>
    %111 = tpu.matmul %109, %110, %cst_35 {dimension_numbers = #tpu.dot_dimension_numbers<[1], [0], [0], [1], [0, 0, 1, 1], [], []>} : vector<16x32xf32>, vector<32x128xf32>, vector<16x128xf32> -> vector<16x128xf32>
    %112 = vector.broadcast %6 : vector<1x128xf32> to vector<16x128xf32>
    %113 = arith.addf %111, %112 : vector<16x128xf32>
    %cst_36 = arith.constant 0.000000e+00 : f32
    %114 = vector.broadcast %cst_36 : f32 to vector<16x128xf32>
    %115 = arith.maximumf %113, %114 : vector<16x128xf32>
    %c0_37 = arith.constant 0 : index
    %c0_38 = arith.constant 0 : index
    %116 = vector.load %arg5[%c0_37, %c0_38] : memref<128x32xf32, #tpu.memory_space<vmem>>, vector<128x32xf32>
    %cst_39 = arith.constant dense<0.000000e+00> : vector<16x32xf32>
    %117 = tpu.matmul %115, %116, %cst_39 {dimension_numbers = #tpu.dot_dimension_numbers<[1], [0], [0], [1], [0, 0, 1, 1], [], []>} : vector<16x128xf32>, vector<128x32xf32>, vector<16x32xf32> -> vector<16x32xf32>
    %118 = vector.broadcast %7 : vector<1x32xf32> to vector<16x32xf32>
    %119 = arith.addf %117, %118 : vector<16x32xf32>
    %120 = arith.addf %119, %109 : vector<16x32xf32>
    %cst_40 = arith.constant dense<0.000000e+00> : vector<16xf32>
    %121 = vector.multi_reduction <add>, %120, %cst_40 [1] : vector<16x32xf32> to vector<16xf32>
    %122 = vector.shape_cast %121 : vector<16xf32> to vector<16x1xf32>
    %cst_41 = arith.constant 3.200000e+01 : f32
    %123 = vector.broadcast %cst_41 : f32 to vector<16x1xf32>
    %124 = arith.divf %122, %123 : vector<16x1xf32>
    %125 = vector.broadcast %124 : vector<16x1xf32> to vector<16x32xf32>
    %126 = arith.subf %120, %125 : vector<16x32xf32>
    %127 = arith.mulf %126, %126 : vector<16x32xf32>
    %cst_42 = arith.constant dense<0.000000e+00> : vector<16xf32>
    %128 = vector.multi_reduction <add>, %127, %cst_42 [1] : vector<16x32xf32> to vector<16xf32>
    %129 = vector.shape_cast %128 : vector<16xf32> to vector<16x1xf32>
    %cst_43 = arith.constant 3.200000e+01 : f32
    %130 = vector.broadcast %cst_43 : f32 to vector<16x1xf32>
    %131 = arith.divf %129, %130 : vector<16x1xf32>
    %132 = vector.broadcast %124 : vector<16x1xf32> to vector<16x32xf32>
    %133 = arith.subf %120, %132 : vector<16x32xf32>
    %cst_44 = arith.constant 9.99999974E-6 : f32
    %134 = vector.broadcast %cst_44 : f32 to vector<16x1xf32>
    %135 = arith.addf %131, %134 : vector<16x1xf32>
    %136 = math.rsqrt %135 : vector<16x1xf32>
    %137 = vector.broadcast %136 : vector<16x1xf32> to vector<16x32xf32>
    %138 = arith.mulf %133, %137 : vector<16x32xf32>
    %139 = vector.broadcast %8 : vector<1x32xf32> to vector<16x32xf32>
    %140 = arith.mulf %138, %139 : vector<16x32xf32>
    %141 = vector.broadcast %9 : vector<1x32xf32> to vector<16x32xf32>
    %142 = arith.addf %140, %141 : vector<16x32xf32>
    %c0_45 = arith.constant 0 : index
    %c0_46 = arith.constant 0 : index
    %143 = vector.load %arg6[%c0_45, %c0_46] : memref<16x32xf32, #tpu.memory_space<vmem>>, vector<16x32xf32>
    tpu.vector_store %arg6[%c0_45, %c0_46], %142 {strides = array<i32>} : memref<16x32xf32, #tpu.memory_space<vmem>>, vector<16x32xf32>,
    return
  }
}

</mosaic_0001>

<bundles_post_ra>
// kernel: transformer_block.1
= control target key start
LH: loop header
LB: loop body
LE: loop exit
PB: predicated region body
PF: predicated region fallthrough
CT: control target
= control target key end

     0   :  { %v1712_v7 = vmov 0.0   ;;  %s2026_s0 = inlined_call_operand.vmem [shape: f32[16,32], index: 0, kind: input, shape index: {}]   ;;  %s2027_s1 = inlined_call_operand.vmem [shape: f32[32,384], index: 1, kind: input, shape index: {}]   ;;  %s2028_s2 = inlined_call_operand.vmem [shape: f32[16,16], index: 2, kind: input, shape index: {}]   ;;  %s2029_s3 = inlined_call_operand.vmem [shape: f32[8,128], index: 3, kind: input, shape index: {}]   ;;  %s2030_s4 = inlined_call_operand.vmem [shape: f32[32,128], index: 4, kind: input, shape index: {}]   ;;  %s2031_s5 = inlined_call_operand.vmem [shape: f32[128,32], index: 5, kind: input, shape index: {}]   ;;  %s2032_s6 = inlined_call_operand.hbm [shape: f32[16,32], index: 6, kind: output, shape index: {}]  }
   0x1   :  { %v30_v0 = vld [vmem:[%s2027_s1 + $0x8] sm:$0xff]  ;;  %v33_v1 = vld [vmem:[%s2027_s1 + $0x20] sm:$0xff]  ;;  %v32_v4 = vld [vmem:[%s2027_s1 + $0x18] sm:$0xff]  ;;  %112 = vmatprep.mubr.f32.mxu0 %v1712_v7 }
   0x2   :  { %v29_v2 = vld [vmem:[%s2027_s1] sm:$0xff]  ;;  %v1509_v3 = vpack.c.bf16 %v33_v1, %v30_v0  ;;  %v36_v5 = vld [vmem:[%s2027_s1 + $0x38] sm:$0xff]  ;;  %v39_v6 = vld [vmem:[%s2027_s1 + $0x50] sm:$0xff] }
   0x3   :  { %v1511_v8 = vpack.c.bf16 %v32_v4, %v29_v2  ;;  %v1513_v9 = vpack.c.bf16 %v39_v6, %v36_v5  ;;  %v35_v10 = vld [vmem:[%s2027_s1 + $0x30] sm:$0xff]  ;;  %v38_v11 = vld [vmem:[%s2027_s1 + $0x48] sm:$0xff] }
   0x4   :  { %1510 = vmatprep.subr.bf16.mxu0 %v1509_v3  ;;  %v31_v12 = vld [vmem:[%s2027_s1 + $0x10] sm:$0xff]  ;;  %v34_v13 = vld [vmem:[%s2027_s1 + $0x28] sm:$0xff]  ;;  %v1515_v14 = vpack.c.bf16 %v38_v11, %v35_v10 }
   0x5   :  { %1512 = vmatpush1.bf16.msra.mxu0 %v1511_v8 }
   0x6   :  { %11 = vsyncpa [#allocation3], 0  ;;  %1514 = vmatprep.subr.bf16.mxu0 %v1513_v9  ;;  %v1517_v15 = vpack.c.bf16 %v34_v13, %v31_v12  ;;  %v37_v16 = vld [vmem:[%s2027_s1 + $0x40] sm:$0xff]  ;;  %v40_v17 = vld [vmem:[%s2027_s1 + $0x58] sm:$0xff]  ;;  %vm41_vm0 = vcmask 261120   ;;  %s1713_s1 = smov 96  }
   0x7   :  { %v1793_v18 = vld [vmem:[%s2026_s0] sm:$0xff]  ;;  %v1521_v19 = vpack.c.bf16 %v40_v17, %v37_v16  ;;  %v1800_v20 = vld [vmem:[%s2026_s0 + $0x8] sm:$0xff]  ;;  %vm1812_vm1 = vmpackc.low %vm41_vm0, %vm41_vm0  ;;  %s1714_s0 = smov 64   ;;  %s1715_s25 = smov 32   ;;  %vm291_vm2 = vcmask 130048  }
   0x8   :  { %v27_v58 = vld [vmem:[%s2028_s2 + $0x8] sm:$0xff]  ;;  %v26_v59 = vld [vmem:[%s2028_s2] sm:$0xff] }
   0x9   :  { %1516 = vmatpush1.bf16.msra.mxu0 %v1515_v14 }
   0xa   :  { %1518 = vmatprep.subr.bf16.mxu0 %v1517_v15 }
   0xc   :  { %1304 = vmatmul.mubr.msk.f32.vlgmr.msra.gmra.mrb[0].mxu0 %vm41_vm0, %v1793_v18 }
   0xd   :  { %118 = vmatprep.mubr.f32.mxu0 %v1712_v7  ;;  %1520 = vmatpush3.bf16.msra.mxu0 %v1517_v15 }
   0xe   :  { %1522 = vmatprep.subr.bf16.mxu0 %v1521_v19 }
  0x10   :  { %1305 = vmatmul.mubr.msk.f32.gmra.mrb[2].mxu0 %vm41_vm0, %v1800_v20 }
  0x11   :  { %1524 = vmatpush3.bf16.msra.mxu0 %v1521_v19  ;;  %1404 = vmatprep.mubr.msk.f32.mxu0 %vm41_vm0, %v1793_v18 }
  0x14   :  { %1405 = vmatmul.mubr.msk.f32.vlgmr.msra.gmra.mrb[4].mxu0 %vm41_vm0, %v1800_v20 }
  0xdf   :  { %v114_v21 = vpop.f32.mrb[0].mxu0 }
  0xe0   :  { %v116_v22 = vpop.f32.mrb[1].mxu0  ;;  %1411 = vmatprep.mubr.msk.f32.mxu0 %vm41_vm0, %v114_v21 }
  0xe3   :  { %v120_v23 = vpop.f32.mrb[2].mxu0 }
  0xe4   :  { %316 = vrot.lane.b32.xlu1 %v120_v23, %s1713_s1  ;;  %v122_v24 = vpop.f32.mrb[3].mxu0 }
  0xe5   :  { %v1525_v26 = vpack.c.bf16 %v122_v24, %v116_v22  ;;  %v1618_v27 = vpack.i.bf16 %v122_v24, %v116_v22 }
  0xe7   :  { %1619 = vrot.lane.b32.xlu0 %v1618_v27, %s1713_s1  ;;  %1527 = vmatprep.subr.msk.bf16.mxu0 %vm1812_vm1, %v1525_v26  ;;  %v1406_v28 = vpop.f32.mrb[4].mxu0 }
  0xe8   :  { %1624 = vrot.lane.b32.xlu1 %v1618_v27, %s1714_s0  ;;  %1530 = vmatpush3.bf16.xpose.msk.msra.mxu0 %vm1812_vm1, %v1525_v26  ;;  %v191_v29 = vpop.f32.mrb[5].mxu0 }
  0xe9   :  { %v1847_v48 = vpack.i.bf16 %v1406_v28, %v191_v29  ;;  %v1849_v49 = vpack.c.bf16 %v1406_v28, %v191_v29 }
  0xeb   :  { %314 = vrot.lane.b32.xlu0 %v114_v21, %s1713_s1 }
  0xec   :  { %601 = vrot.lane.b32.xlu1 %v114_v21, %s1714_s0 }
  0xef   :  { %1629 = vrot.lane.b32.xlu0 %v1618_v27, %s1715_s25  ;;  %1412 = vmatmul.mubr.msk.f32.vlgmr.msra.gmra.mrb[6].mxu0 %vm41_vm0, %v120_v23 }
  0xf0   :  { %807 = vrot.lane.b32.xlu1 %v114_v21, %s1715_s25 }
  0xf3   :  { %603 = vrot.lane.b32.xlu0 %v120_v23, %s1714_s0 }
  0xf7   :  { %809 = vrot.lane.b32.xlu0 %v120_v23, %s1715_s25 }
 0x156   :  { %v317_v30 = vpop.permute.xlu1 %316 }
 0x159   :  { %v1620_v31 = vpop.permute.xlu0 %1619 }
 0x15a   :  { %v1622_v32 = vunpack.i.h.bf16 %v1620_v31  ;;  %v1621_v33 = vunpack.i.l.bf16 %v1620_v31  ;;  %v1625_v34 = vpop.permute.xlu1 %1624 }
 0x15b   :  { %v1627_v35 = vunpack.i.h.bf16 %v1625_v34  ;;  %v1626_v36 = vunpack.i.l.bf16 %v1625_v34 }
 0x15c   :  { %v1531_v37 = vpack.c.bf16 %v1622_v32, %v1621_v33 }
 0x15d   :  { %v1545_v38 = vpack.c.bf16 %v1627_v35, %v1626_v36  ;;  %v315_v39 = vpop.permute.xlu0 %314 }
 0x15e   :  { %1533 = vmatprep.subr.msk.bf16.mxu1 %vm1812_vm1, %v1531_v37  ;;  %1418 = vmatprep.mubr.msk.f32.mxu1 %vm41_vm0, %v315_v39  ;;  %v602_v43 = vpop.permute.xlu1 %601 }
 0x15f   :  { %1536 = vmatpush3.bf16.xpose.msk.msra.mxu1 %vm1812_vm1, %v1531_v37 }
 0x160   :  { %1547 = vmatprep.subr.msk.bf16.mxu1 %vm1812_vm1, %v1545_v38 }
 0x161   :  { %v1630_v40 = vpop.permute.xlu0 %1629 }
 0x162   :  { %v1632_v41 = vunpack.i.h.bf16 %v1630_v40  ;;  %v1631_v42 = vunpack.i.l.bf16 %v1630_v40  ;;  %v808_v46 = vpop.permute.xlu1 %807 }
 0x164   :  { %v1555_v44 = vpack.c.bf16 %v1632_v41, %v1631_v42 }
 0x165   :  { %v604_v45 = vpop.permute.xlu0 %603 }
 0x166   :  { %1419 = vmatmul.mubr.msk.f32.vlgmr.msra.gmra.mrb[0].mxu1 %vm41_vm0, %v317_v30 }
 0x167   :  { %1550 = vmatpush3.bf16.xpose.msk.msra.mxu1 %vm1812_vm1, %v1545_v38  ;;  %1439 = vmatprep.mubr.msk.f32.mxu1 %vm41_vm0, %v602_v43 }
 0x168   :  { %1557 = vmatprep.subr.msk.bf16.mxu1 %vm1812_vm1, %v1555_v44 }
 0x169   :  { %v810_v47 = vpop.permute.xlu0 %809 }
 0x16e   :  { %1440 = vmatmul.mubr.msk.f32.vlgmr.msra.gmra.mrb[2].mxu1 %vm41_vm0, %v604_v45 }
 0x16f   :  { %1560 = vmatpush3.bf16.xpose.msk.msra.mxu1 %vm1812_vm1, %v1555_v44  ;;  %1453 = vmatprep.mubr.msk.f32.mxu1 %vm41_vm0, %v808_v46 }
 0x176   :  { %1454 = vmatmul.mubr.msk.f32.vlgmr.msra.gmra.mrb[4].mxu1 %vm41_vm0, %v810_v47 }
 0x1c2   :  { %v1413_v50 = vpop.f32.mrb[6].mxu0 }
 0x1c3   :  { %v278_v51 = vpop.f32.mrb[7].mxu0  ;;  %v288_v56 = vmul.f32 0.17677669, %v1413_v50 }
 0x1c4   :  { %v287_v53 = vmul.f32 0.17677669, %v278_v51 }
 0x1c5   :  { %v290_v1 = vadd.f32 %v288_v56, %v27_v58 }
 0x1c6   :  { %v289_v63 = vadd.f32 %v287_v53, %v26_v59 }
 0x1c7   :  { %v295_v7 = vsel %vm291_vm2, %v290_v1, -inf }
 0x1c8   :  { %v292_v5 = vsel %vm291_vm2, %v289_v63, -inf }
 0x239   :  { %v1420_v52 = vpop.f32.mrb[0].mxu1 }
 0x23a   :  { %v406_v54 = vmul.f32 0.17677669, %v1420_v52  ;;  %v396_v55 = vpop.f32.mrb[1].mxu1 }
 0x23b   :  { %v405_v57 = vmul.f32 0.17677669, %v396_v55 }
 0x23c   :  { %v408_v60 = vadd.f32 %v406_v54, %v27_v58 }
 0x23d   :  { %v407_v61 = vadd.f32 %v405_v57, %v26_v59 }
 0x23e   :  { %v412_v62 = vsel %vm291_vm2, %v408_v60, -inf }
 0x23f   :  { %413 = vmax.xlane.f32.xlu0 %v412_v62  ;;  %v409_v0 = vsel %vm291_vm2, %v407_v61, -inf }
 0x240   :  { %410 = vmax.xlane.f32.xlu1 %v409_v0 }
 0x241   :  { %v1441_v2 = vpop.f32.mrb[2].mxu1 }
 0x242   :  { %v693_v3 = vmul.f32 0.17677669, %v1441_v2  ;;  %v683_v4 = vpop.f32.mrb[3].mxu1 }
 0x243   :  { %v692_v6 = vmul.f32 0.17677669, %v683_v4  ;;  %293 = vmax.xlane.f32.xlu0 %v292_v5 }
 0x244   :  { %296 = vmax.xlane.f32.xlu1 %v295_v7  ;;  %v695_v8 = vadd.f32 %v693_v3, %v27_v58 }
 0x245   :  { %v1861_v9 = vadd.f32 %v692_v6, %v26_v59 }
 0x246   :  { %v699_v10 = vsel %vm291_vm2, %v695_v8, -inf }
 0x247   :  { %v696_v11 = vsel %vm291_vm2, %v1861_v9, -inf }
 0x248   :  { %700 = vmax.xlane.f32.xlu1 %v699_v10  ;;  %697 = vmax.xlane.f32.xlu0 %v696_v11 }
 0x249   :  { %v1455_v12 = vpop.f32.mrb[4].mxu1 }
 0x24a   :  { %v899_v13 = vmul.f32 0.17677669, %v1455_v12  ;;  %v889_v14 = vpop.f32.mrb[5].mxu1 }
 0x24b   :  { %v898_v15 = vmul.f32 0.17677669, %v889_v14 }
 0x24c   :  { %v901_v16 = vadd.f32 %v899_v13, %v27_v58 }
 0x24d   :  { %v900_v17 = vadd.f32 %v898_v15, %v26_v59 }
 0x24e   :  { %v905_v19 = vsel %vm291_vm2, %v901_v16, -inf }
 0x24f   :  { %906 = vmax.xlane.f32.xlu1 %v905_v19  ;;  %v902_v21 = vsel %vm291_vm2, %v900_v17, -inf }
 0x250   :  { %903 = vmax.xlane.f32.xlu0 %v902_v21 }
 0x2cc   :  { %v414_v22 = vpop.xlane.xlu0 %413 }
 0x2cd   :  { %v411_v23 = vpop.xlane.xlu1 %410  ;;  %v416_v25 = vsub.f32 %v408_v60, %v414_v22 }
 0x2ce   :  { %v415_v24 = vsub.f32 %v407_v61, %v411_v23 }
 0x2cf   :  { %v419_v32 = vmul.f32 1.442695, %v416_v25 }
 0x2d0   :  { %v294_v26 = vpop.xlane.xlu0 %293  ;;  %v417_v30 = vmul.f32 1.442695, %v415_v24 }
 0x2d1   :  { %v298_v27 = vsub.f32 %v289_v63, %v294_v26  ;;  %v297_v28 = vpop.xlane.xlu1 %296 }
 0x2d2   :  { %v299_v29 = vsub.f32 %v290_v1, %v297_v28 }
 0x2d3   :  { %v300_v31 = vmul.f32 1.442695, %v298_v27 }
 0x2d4   :  { %v302_v33 = vmul.f32 1.442695, %v299_v29 }
 0x2d5   :  { %1648 = vpow2.f32 %v300_v31  ;;  %v701_v34 = vpop.xlane.xlu1 %700  ;;  %v698_v37 = vpop.xlane.xlu0 %697 }
 0x2d6   :  { %1650 = vpow2.f32 %v302_v33  ;;  %v703_v35 = vsub.f32 %v695_v8, %v701_v34  ;;  %v702_v60 = vsub.f32 %v1861_v9, %v698_v37 }
 0x2d7   :  { %1652 = vpow2.f32 %v417_v30 }
 0x2d8   :  { %1654 = vpow2.f32 %v419_v32  ;;  %v706_v36 = vmul.f32 1.442695, %v703_v35  ;;  %v704_v61 = vmul.f32 1.442695, %v702_v60  ;;  %v1061_v60 = vld [vmem:[%s2030_s4 + $0x8] sm:$0xff] }
 0x2da   :  { %1656 = vpow2.f32 %v706_v36  ;;  %v1013_v36 = vlaneseq }
 0x2dc   :  { %v907_v38 = vpop.xlane.xlu1 %906  ;;  %v1909_v37 = vshrl.u32 %v1013_v36, 7 }
 0x2dd   :  { %v909_v39 = vsub.f32 %v901_v16, %v907_v38  ;;  %v904_v40 = vpop.xlane.xlu0 %903 }
 0x2de   :  { %v908_v41 = vsub.f32 %v900_v17, %v904_v40  ;;  %v1015_v38 = vsub.s32 0, %v1909_v37 }
 0x2df   :  { %v1649_v42 = vpop.eup %1648  ;;  %v912_v43 = vmul.f32 1.442695, %v909_v39  ;;  %v1915_v39 = vld [vmem:[%s2029_s3] sm:$0xff] }
 0x2e0   :  { %v1868_v44 = vpop.eup %1650  ;;  %v910_v45 = vmul.f32 1.442695, %v908_v41  ;;  %v304_v46 = vsel %vm291_vm2, %v1649_v42, 0.0  ;;  %v1016_v40 = vrot.slane %v1915_v39, %v1015_v38 }
 0x2e1   :  { %v1653_v47 = vpop.eup %1652  ;;  %1658 = vpow2.f32 %v912_v43  ;;  %305 = vadd.xlane.f32.xlu0 %v304_v46  ;;  %v307_v50 = vsel %vm291_vm2, %v1868_v44, 0.0 }
 0x2e2   :  { %v1655_v51 = vpop.eup %1654  ;;  %308 = vadd.xlane.f32.xlu1 %v307_v50  ;;  %1660 = vpow2.f32 %v910_v45  ;;  %v421_v52 = vsel %vm291_vm2, %v1653_v47, 0.0 }
 0x2e3   :  { %v424_v53 = vsel %vm291_vm2, %v1655_v51, 0.0  ;;  %1662 = vpow2.f32 %v704_v61 }
 0x2e4   :  { %v1875_v54 = vpop.eup %1656 }
 0x2e5   :  { %422 = vadd.xlane.f32.xlu0 %v421_v52  ;;  %v711_v55 = vsel %vm291_vm2, %v1875_v54, 0.0 }
 0x2e6   :  { %425 = vadd.xlane.f32.xlu1 %v424_v53 }
 0x2ea   :  { %712 = vadd.xlane.f32.xlu1 %v711_v55 }
 0x2eb   :  { %v1879_v56 = vpop.eup %1658 }
 0x2ec   :  { %v917_v57 = vsel %vm291_vm2, %v1879_v56, 0.0  ;;  %v1883_v58 = vpop.eup %1660 }
 0x2ed   :  { %v914_v59 = vsel %vm291_vm2, %v1883_v58, 0.0  ;;  %v1663_v62 = vpop.eup %1662 }
 0x2ee   :  { %918 = vadd.xlane.f32.xlu1 %v917_v57  ;;  %v708_v63 = vsel %vm291_vm2, %v1663_v62, 0.0 }
 0x2f2   :  { %915 = vadd.xlane.f32.xlu1 %v914_v59  ;;  %v1060_v59 = vld [vmem:[%s2030_s4] sm:$0xff] }
 0x2f3   :  { %v1565_v61 = vpack.c.bf16 %v1061_v60, %v1060_v59 }
 0x2fb   :  { %1634 = vrot.lane.b32.xlu0 %v1847_v48, %s1713_s1 }
 0x303   :  { %1639 = vrot.lane.b32.xlu1 %v1847_v48, %s1714_s0 }
 0x31a   :  { %709 = vadd.xlane.f32.xlu0 %v708_v63  ;;  %v1063_v63 = vld [vmem:[%s2030_s4 + $0x18] sm:$0xff] }
 0x330   :  { %1644 = vrot.lane.b32.xlu0 %v1847_v48, %s1715_s25 }
 0x36e   :  { %v306_v0 = vpop.xlane.xlu0 %305 }
 0x36f   :  { %v309_v1 = vpop.xlane.xlu1 %308  ;;  %1664 = vrcp.f32 %v306_v0 }
 0x372   :  { %v423_v2 = vpop.xlane.xlu0 %422 }
 0x373   :  { %1666 = vrcp.f32 %v423_v2  ;;  %v426_v3 = vpop.xlane.xlu1 %425  ;;  %v1152_v2 = vld [vmem:[%s2031_s5 + $0x8] sm:$0xff] }
 0x374   :  { %1668 = vrcp.f32 %v426_v3  ;;  %v1153_v3 = vld [vmem:[%s2031_s5 + $0x10] sm:$0xff] }
 0x375   :  { %1670 = vrcp.f32 %v309_v1  ;;  %v1151_v1 = vld [vmem:[%s2031_s5] sm:$0xff] }
 0x376   :  { %v1635_v4 = vpop.permute.xlu0 %1634 }
 0x377   :  { %v1637_v5 = vunpack.i.h.bf16 %v1635_v4  ;;  %v1636_v6 = vunpack.i.l.bf16 %v1635_v4  ;;  %v713_v7 = vpop.xlane.xlu1 %712  ;;  %v1573_v4 = vpack.c.bf16 %v1152_v2, %v1151_v1 }
 0x378   :  { %1672 = vrcp.f32 %v713_v7  ;;  %v1155_v7 = vld [vmem:[%s2031_s5 + $0x20] sm:$0xff] }
 0x379   :  { %v1537_v8 = vpack.c.bf16 %v1637_v5, %v1636_v6  ;;  %v1665_v10 = vpop.eup %1664  ;;  %v1154_v5 = vld [vmem:[%s2031_s5 + $0x18] sm:$0xff]  ;;  %1574 = vmatprep.subr.bf16.mxu1 %v1573_v4 }
 0x37a   :  { %v311_v15 = vmul.f32 %v1665_v10, %v1649_v42  ;;  %v1577_v6 = vpack.c.bf16 %v1154_v5, %v1153_v3  ;;  %1576 = vmatpush3.bf16.msra.mxu1 %v1573_v4  ;;  %v1157_v10 = vld [vmem:[%s2031_s5 + $0x30] sm:$0xff] }
 0x37b   :  { %v919_v9 = vpop.xlane.xlu1 %918  ;;  %1538 = vmatprep.subr.bf16.mxu0 %v1537_v8 }
 0x37c   :  { %1540 = vmatpush3.bf16.msra.mxu0 %v1537_v8  ;;  %v1156_v8 = vld [vmem:[%s2031_s5 + $0x28] sm:$0xff]  ;;  %1578 = vmatprep.subr.bf16.mxu1 %v1577_v6 }
 0x37d   :  { %v1667_v11 = vpop.eup %1666  ;;  %1542 = vmatprep.subr.bf16.mxu0 %v1849_v49 }
 0x37e   :  { %v1669_v48 = vpop.eup %1668  ;;  %v428_v12 = vmul.f32 %v1667_v11, %v1653_v47  ;;  %v1158_v11 = vld [vmem:[%s2031_s5 + $0x38] sm:$0xff]  ;;  %1580 = vmatpush3.bf16.msra.mxu1 %v1577_v6 }
 0x37f   :  { %v430_v13 = vmul.f32 %v1669_v48, %v1655_v51  ;;  %v916_v14 = vpop.xlane.xlu1 %915  ;;  %v1671_v17 = vpop.eup %1670  ;;  %v1585_v48 = vpack.c.bf16 %v1158_v11, %v1157_v10 }
 0x380   :  { %1425 = vmatprep.mubr.msk.f32.mxu0 %vm291_vm2, %v428_v12  ;;  %v313_v23 = vmul.f32 %v1671_v17, %v1868_v44  ;;  %1674 = vrcp.f32 %v916_v14  ;;  %v1159_v12 = vld [vmem:[%s2031_s5 + $0x40] sm:$0xff] }
 0x381   :  { %1426 = vmatmul.mubr.msk.f32.vlgmr.msra.gmra.mrb[8].mxu0 %vm291_vm2, %v430_v13  ;;  %v1160_v13 = vld [vmem:[%s2031_s5 + $0x48] sm:$0xff] }
 0x382   :  { %1544 = vmatpush3.bf16.msra.mxu0 %v1849_v49  ;;  %1432 = vmatprep.mubr.msk.f32.mxu0 %vm291_vm2, %v311_v15  ;;  %v1673_v28 = vpop.eup %1672  ;;  %v1589_v14 = vpack.c.bf16 %v1160_v13, %v1159_v12  ;;  %v1161_v15 = vld [vmem:[%s2031_s5 + $0x50] sm:$0xff] }
 0x383   :  { %v1640_v16 = vpop.permute.xlu1 %1639  ;;  %v717_v32 = vmul.f32 %v1673_v28, %v1875_v54  ;;  %v1050_v28 = vsub.s32 1, %v1909_v37 }
 0x384   :  { %v1642_v19 = vunpack.i.h.bf16 %v1640_v16  ;;  %v1641_v21 = vunpack.i.l.bf16 %v1640_v16  ;;  %v1162_v16 = vld [vmem:[%s2031_s5 + $0x58] sm:$0xff] }
 0x385   :  { %v1593_v17 = vpack.c.bf16 %v1162_v16, %v1161_v15  ;;  %v1282_v15 = vsub.s32 6, %v1909_v37 }
 0x386   :  { %v1551_v22 = vpack.c.bf16 %v1642_v19, %v1641_v21  ;;  %v1163_v19 = vld [vmem:[%s2031_s5 + $0x60] sm:$0xff]  ;;  %v1164_v21 = vld [vmem:[%s2031_s5 + $0x68] sm:$0xff] }
 0x388   :  { %1552 = vmatprep.subr.bf16.mxu0 %v1551_v22 }
 0x389   :  { %1433 = vmatmul.mubr.msk.f32.vlgmr.msra.gmra.mrb[8].mxu0 %vm291_vm2, %v313_v23 }
 0x38a   :  { %1554 = vmatpush3.bf16.msra.mxu0 %v1551_v22  ;;  %v1675_v29 = vpop.eup %1674  ;;  %v1597_v22 = vpack.c.bf16 %v1164_v21, %v1163_v19 }
 0x38b   :  { %v921_v33 = vmul.f32 %v1675_v29, %v1883_v58  ;;  %v1056_v29 = vsub.s32 2, %v1909_v37 }
 0x3a7   :  { %v710_v24 = vpop.xlane.xlu0 %709 }
 0x3a8   :  { %1676 = vrcp.f32 %v710_v24 }
 0x3a9   :  { %1678 = vrcp.f32 %v919_v9  ;;  %v1581_v9 = vpack.c.bf16 %v1156_v8, %v1155_v7 }
 0x3ab   :  { %v1645_v25 = vpop.permute.xlu0 %1644  ;;  %1582 = vmatprep.subr.bf16.mxu1 %v1581_v9 }
 0x3ac   :  { %v1647_v26 = vunpack.i.h.bf16 %v1645_v25  ;;  %v1646_v49 = vunpack.i.l.bf16 %v1645_v25  ;;  %1584 = vmatpush3.bf16.msra.mxu1 %v1581_v9 }
 0x3ad   :  { %1586 = vmatprep.subr.bf16.mxu1 %v1585_v48 }
 0x3ae   :  { %v1561_v27 = vpack.c.bf16 %v1647_v26, %v1646_v49 }
 0x3b0   :  { %1562 = vmatprep.subr.bf16.mxu0 %v1561_v27  ;;  %1588 = vmatpush3.bf16.msra.mxu1 %v1585_v48 }
 0x3b1   :  { %1590 = vmatprep.subr.bf16.mxu1 %v1589_v14 }
 0x3b2   :  { %v1677_v30 = vpop.eup %1676 }
 0x3b3   :  { %v715_v31 = vmul.f32 %v1677_v30, %v1663_v62  ;;  %v1679_v34 = vpop.eup %1678  ;;  %v1062_v62 = vld [vmem:[%s2030_s4 + $0x10] sm:$0xff]  ;;  %v1051_v30 = vrot.slane %v1915_v39, %v1050_v28 }
 0x3b4   :  { %v923_v35 = vmul.f32 %v1679_v34, %v1879_v56  ;;  %v1569_v0 = vpack.c.bf16 %v1063_v63, %v1062_v62  ;;  %1592 = vmatpush3.bf16.msra.mxu1 %v1589_v14  ;;  %v1276_v14 = vsub.s32 5, %v1909_v37 }
 0x3b5   :  { %1446 = vmatprep.mubr.msk.f32.mxu0 %vm291_vm2, %v715_v31  ;;  %1594 = vmatprep.subr.bf16.mxu1 %v1593_v17 }
 0x3b6   :  { %1447 = vmatmul.mubr.msk.f32.vlgmr.msra.gmra.mrb[8].mxu0 %vm291_vm2, %v717_v32  ;;  %v1277_v16 = vrot.slane %v1915_v39, %v1276_v14 }
 0x3b7   :  { %1564 = vmatpush3.bf16.msra.mxu0 %v1561_v27  ;;  %1460 = vmatprep.mubr.msk.f32.mxu0 %vm291_vm2, %v921_v33  ;;  %v1057_v33 = vrot.slane %v1915_v39, %v1056_v29 }
 0x3b8   :  { %1566 = vmatprep.subr.bf16.mxu0 %v1565_v61  ;;  %1596 = vmatpush3.bf16.msra.mxu1 %v1593_v17 }
 0x3b9   :  { %1598 = vmatprep.subr.bf16.mxu1 %v1597_v22 }
 0x3bc   :  { %1600 = vmatpush3.bf16.msra.mxu1 %v1597_v22  ;;  %v1283_v22 = vrot.slane %v1915_v39, %v1282_v15 }
 0x3be   :  { %1461 = vmatmul.mubr.msk.f32.vlgmr.msra.gmra.mrb[8].mxu0 %vm291_vm2, %v923_v35 }
 0x3bf   :  { %1568 = vmatpush3.bf16.msra.mxu0 %v1565_v61 }
 0x3c0   :  { %1570 = vmatprep.subr.bf16.mxu0 %v1569_v0 }
 0x3c3   :  { %1572 = vmatpush3.bf16.msra.mxu0 %v1569_v0 }
 0x491   :  { %v1462_v41 = vpop.f32.mrb[8].mxu0 }
 0x492   :  { %v1018_v42 = vadd.f32 %v1462_v41, %v1016_v40  ;;  %v1002_v43 = vpop.f32.mrb[9].mxu0 }
 0x493   :  { %v1017_v44 = vadd.f32 %v1016_v40, %v1002_v43  ;;  %v1166_v43 = vld [vmem:[%s2031_s5 + $0x78] sm:$0xff] }
 0x494   :  { %v1020_v45 = vadd.f32 %v1018_v42, %v1800_v20  ;;  %v1165_v42 = vld [vmem:[%s2031_s5 + $0x70] sm:$0xff]  ;;  %s1716_s5 = smov [#allocation2]  }
 0x495   :  { %v1019_v46 = vadd.f32 %v1017_v44, %v1793_v18  ;;  %v1601_v44 = vpack.c.bf16 %v1166_v43, %v1165_v42  ;;  %s1293_s17 = sshll.u32 %s1716_s5, 4  ;;  %s1294_s17 = int_to_ptr.vmem [resolvable:$true] %s1293_s17 }
 0x496   :  { %v1024_v47 = vsel %vm41_vm0, %v1020_v45, 0.0  ;;  %s1688_s18 = scalar_lea.vmem %s1294_s17, 256  ;;  %p1693_p1 = scmp.lt.s32.totalorder %s1294_s17, %s1294_s17 }
 0x497   :  { %1025 = vadd.xlane.f32.xlu1 %v1024_v47  ;;  %v1021_v50 = vsel %vm41_vm0, %v1019_v46, 0.0  ;;  %1602 = vmatprep.subr.bf16.mxu1 %v1601_v44  ;;  %p1689_p0 = scmp.ne.s32.totalorder %s1294_s17, %s1688_s18  ;;  %p1694_p2 = scmp.lt.s32.totalorder %s1688_s18, %s1688_s18 }
 0x498   :  { %1022 = vadd.xlane.f32.xlu0 %v1021_v50  ;;  %1604 = vmatpush3.bf16.msra.mxu1 %v1601_v44 }
 0x499   :  { %p1695_p3 = por %p1694_p2, %p1693_p1 }
 0x49b   :  { %p1696_p4 = pnand %p1695_p3, %p1689_p0 }
 0x524   :  { %v1026_v51 = vpop.xlane.xlu1 %1025 }
 0x525   :  { %v1029_v52 = vmul.f32 0.03125, %v1026_v51  ;;  %v1023_v53 = vpop.xlane.xlu0 %1022 }
 0x526   :  { %v1028_v54 = vmul.f32 0.03125, %v1023_v53 }
 0x527   :  { %v1922_v55 = vsub.f32 %v1020_v45, %v1029_v52  ;;  %v1066_v45 = vsub.s32 3, %v1909_v37 }
 0x528   :  { %v1924_v56 = vsub.f32 %v1019_v46, %v1028_v54 }
 0x529   :  { %v1033_v18 = vmul.f32 %v1922_v55, %v1922_v55  ;;  %v1067_v46 = vrot.slane %v1915_v39, %v1066_v45 }
 0x52a   :  { %v1032_v57 = vmul.f32 %v1924_v56, %v1924_v56 }
 0x52b   :  { %v1037_v58 = vsel %vm41_vm0, %v1033_v18, 0.0 }
 0x52c   :  { %v1034_v20 = vsel %vm41_vm0, %v1032_v57, 0.0 }
 0x52d   :  { %1035 = vadd.xlane.f32.xlu0 %v1034_v20 }
 0x531   :  { %1038 = vadd.xlane.f32.xlu0 %v1037_v58 }
 0x5ba   :  { %v1036_v23 = vpop.xlane.xlu0 %1035 }
 0x5bb   :  { %v1040_v24 = vmul.f32 0.03125, %v1036_v23 }
 0x5bd   :  { %v1042_v25 = vadd.f32 1e-05, %v1040_v24 }
 0x5be   :  { %v1039_v26 = vpop.xlane.xlu0 %1038 }
 0x5bf   :  { %1680 = vrsqrt.f32 %v1042_v25  ;;  %v1041_v49 = vmul.f32 0.03125, %v1039_v26 }
 0x5c1   :  { %v1043_v27 = vadd.f32 1e-05, %v1041_v49 }
 0x5c3   :  { %1682 = vrsqrt.f32 %v1043_v27 }
 0x5c9   :  { %v1681_v31 = vpop.eup %1680 }
 0x5ca   :  { %v1046_v32 = vmul.f32 %v1681_v31, %v1924_v56 }
 0x5cc   :  { %v1052_v34 = vmul.f32 %v1051_v30, %v1046_v32 }
 0x5cd   :  { %v1683_v35 = vpop.eup %1682 }
 0x5ce   :  { %v1047_v36 = vmul.f32 %v1683_v35, %v1922_v55  ;;  %v1058_v38 = vadd.f32 %v1057_v33, %v1052_v34  ;;  %v1169_v55 = vsub.s32 4, %v1909_v37 }
 0x5d0   :  { %v1053_v40 = vmul.f32 %v1051_v30, %v1047_v36  ;;  %1471 = vmatprep.mubr.msk.f32.mxu0 %vm41_vm0, %v1058_v38  ;;  %v1170_v56 = vrot.slane %v1915_v39, %v1169_v55 }
 0x5d2   :  { %v1059_v41 = vadd.f32 %v1057_v33, %v1053_v40 }
 0x5d4   :  { %1472 = vmatmul.mubr.msk.f32.vlgmr.msra.gmra.mrb[10].mxu0 %vm41_vm0, %v1059_v41 }
 0x6a7   :  { %v1473_v47 = vpop.f32.mrb[10].mxu0 }
 0x6a8   :  { %v1146_v50 = vadd.f32 %v1473_v47, %v1067_v46  ;;  %v1140_v51 = vpop.f32.mrb[11].mxu0 }
 0x6a9   :  { %v1141_v52 = vadd.f32 %v1140_v51, %v1067_v46 }
 0x6aa   :  { %v1150_v54 = vmax.f32 %v1146_v50, 0.0 }
 0x6ab   :  { %v1149_v53 = vmax.f32 %v1141_v52, 0.0 }
 0x6ad   :  { %1506 = vmatprep.mubr.f32.mxu1 %v1149_v53 }
 0x6ae   :  { %1507 = vmatmul.mubr.f32.vlgmr.msra.gmra.mrb[6].mxu1 %v1150_v54 }
 0x781   :  { %v1508_v57 = vpop.f32.mrb[6].mxu1 }
 0x782   :  { %v1243_v20 = vadd.f32 %v1508_v57, %v1170_v56  ;;  %v1237_v18 = vpop.f32.mrb[7].mxu1 }
 0x783   :  { %v1238_v58 = vadd.f32 %v1237_v18, %v1170_v56 }
 0x784   :  { %v1247_v59 = vadd.f32 %v1243_v20, %v1059_v41 }
 0x785   :  { %v1246_v60 = vadd.f32 %v1238_v58, %v1058_v38 }
 0x786   :  { %v1251_v61 = vsel %vm41_vm0, %v1247_v59, 0.0 }
 0x787   :  { %1252 = vadd.xlane.f32.xlu0 %v1251_v61  ;;  %v1248_v62 = vsel %vm41_vm0, %v1246_v60, 0.0 }
 0x788   :  { %1249 = vadd.xlane.f32.xlu1 %v1248_v62 }
 0x814   :  { %v1253_v63 = vpop.xlane.xlu0 %1252 }
 0x815   :  { %v1255_v0 = vmul.f32 0.03125, %v1253_v63  ;;  %v1250_v1 = vpop.xlane.xlu1 %1249 }
 0x816   :  { %v1254_v2 = vmul.f32 0.03125, %v1250_v1 }
 0x817   :  { %v1257_v3 = vsub.f32 %v1247_v59, %v1255_v0 }
 0x818   :  { %v1256_v4 = vsub.f32 %v1246_v60, %v1254_v2 }
 0x819   :  { %v1259_v5 = vmul.f32 %v1257_v3, %v1257_v3 }
 0x81a   :  { %v1258_v6 = vmul.f32 %v1256_v4, %v1256_v4 }
 0x81b   :  { %v1263_v7 = vsel %vm41_vm0, %v1259_v5, 0.0 }
 0x81c   :  { %1264 = vadd.xlane.f32.xlu0 %v1263_v7  ;;  %v1260_v8 = vsel %vm41_vm0, %v1258_v6, 0.0 }
 0x81d   :  { %1261 = vadd.xlane.f32.xlu1 %v1260_v8 }
 0x8a9   :  { %v1265_v9 = vpop.xlane.xlu0 %1264 }
 0x8aa   :  { %v1267_v10 = vmul.f32 0.03125, %v1265_v9  ;;  %v1262_v11 = vpop.xlane.xlu1 %1261 }
 0x8ab   :  { %v1266_v48 = vmul.f32 0.03125, %v1262_v11 }
 0x8ac   :  { %v1269_v12 = vadd.f32 1e-05, %v1267_v10 }
 0x8ad   :  { %v1268_v13 = vadd.f32 1e-05, %v1266_v48 }
 0x8ae   :  { %1684 = vrsqrt.f32 %v1269_v12 }
 0x8af   :  { %1686 = vrsqrt.f32 %v1268_v13 }
 0x8b8   :  { %v1685_v17 = vpop.eup %1684 }
 0x8b9   :  { %v1687_v19 = vpop.eup %1686  ;;  %v1273_v21 = vmul.f32 %v1685_v17, %v1257_v3 }
 0x8ba   :  { %v1272_v23 = vmul.f32 %v1687_v19, %v1256_v4 }
 0x8bb   :  { %v1279_v24 = vmul.f32 %v1277_v16, %v1273_v21 }
 0x8bc   :  { %v1278_v25 = vmul.f32 %v1277_v16, %v1272_v23 }
 0x8bd   :  { %v1285_v26 = vadd.f32 %v1283_v22, %v1279_v24 }
 0x8be   :  { %v1284_v49 = vadd.f32 %v1283_v22, %v1278_v25 }
 0x8bf   :  { %1287 = vst.msk [vmem:[#allocation2 + $0x8] sm:$0xff] %vm41_vm0, %v1285_v26 }
 0x8c0   :  { %1286 = vst.msk [vmem:[#allocation2] sm:$0xff] %vm41_vm0, %v1284_v49 }
 0x8c1   :  { %1699 = shalt.err (!%p1696_p4)
}
 0x8c2   :  { %s1700_s21 = scalar_lea.hbm %s2032_s6, 256 }
 0x8c3   :  { %p1701_p5 = scmp.ne.s32.totalorder %s2032_s6, %s1700_s21  ;;  %p1704_p6 = scmp.lt.u32.totalorder %s1700_s21, %s2032_s6 }
 0x8c5   :  { %p1706_p7 = pnand %p1704_p6, %p1701_p5 }
 0x8c7   :  { %1709 = shalt.err (!%p1706_p7)
}
 0x8c8   :  { %s1717_s1 = smov 128   ;;  %s1718_s0 = smov 8  }
 0x8c9   :  { %1299 = dma.vmem_to_hbm [thread:$0]  %s1294_s17, 256, %s2032_s6, [#allocation3], %s1717_s1, %s1717_s1, %s1718_s0  }
 0x8ca   :  { %1710 = dma.done.wait [#allocation3], 256  }
 0x8cb   :  { %1711 = vsyncadd [#allocation3], 4294967040 }
 0x8cc   :  { %1303 = vsyncpa [#allocation3], 1 }

</bundles_post_ra>
